<compile_context>
chip_gen: v5e
topology: v5e:2x2
jax: 0.10.0
libtpu: 0.0.40
codegen_flags: <defaults>
</compile_context>

<pallas_src>
import functools

import jax
import jax.numpy as jnp
from jax.experimental import pallas as pl
from jax.experimental.pallas import tpu as pltpu


def _fused_conv_bn_relu_kernel(x_ref, w_ref, shift_ref, o_ref, patch_ref, *,
                               taps, pad, seq_len, b_blk, c_in):
    """Fused all-branch conv (im2col) + folded BN + ReLU for B_blk batch rows.

    x_ref     : (B_blk, L, C_in)              input block (NLC layout)
    w_ref     : (taps*C_in, C_out_pad)        folded, BN-scaled weights (resident)
    shift_ref : (1, C_out_pad)                folded conv-bias + BN shift (f32)
    o_ref     : (B_blk*L, C_out_pad)          lane-dense concatenated output
    patch_ref : (B_blk, L, taps*C_in) f32     VMEM im2col patch scratch
    """
    # Full-tile load + upcast: the shifted-slice shuffles below stay in f32.
    x = x_ref[...].astype(jnp.float32)

    # Build the im2col patch: tap t's column block holds x shifted by (t - pad)
    # within each batch row, with the out-of-range edge rows zeroed.  Each row's
    # zero padding lives inside its own patch rows, so batching multiple rows
    # per block cannot leak data across rows.  NOTE: the edge zeros never
    # change, but we re-write them every step on purpose — gating scratch init
    # on program_id==0 is unsafe under dimension_semantics=("parallel",).
    for t in range(taps):
        s = t - pad
        lo = max(0, -s)                 # first valid dest row within a batch row
        hi = min(seq_len, seq_len - s)  # one past last valid dest row
        if lo > 0:
            patch_ref[:, pl.ds(0, lo), pl.ds(t * c_in, c_in)] = (
                jnp.zeros((b_blk, lo, c_in), jnp.float32))
        if hi < seq_len:
            patch_ref[:, pl.ds(hi, seq_len - hi), pl.ds(t * c_in, c_in)] = (
                jnp.zeros((b_blk, seq_len - hi, c_in), jnp.float32))
        patch_ref[:, pl.ds(lo, hi - lo), pl.ds(t * c_in, c_in)] = (
            x[:, lo + s:hi + s, :])

    # Single MXU push: M = B_blk*L, K = taps*C_in, N = C_out_pad (128-multiple).
    lhs = patch_ref[...].reshape(b_blk * seq_len, taps * c_in).astype(w_ref.dtype)
    acc = jnp.dot(lhs, w_ref[...], preferred_element_type=jnp.float32)

    # Folded bias/BN + ReLU; one unmasked lane-dense store, cast only here.
    o_ref[...] = jnp.maximum(acc + shift_ref[...], 0.0).astype(o_ref.dtype)


def _pick_batch_block(n, seq_len, target_m=512):
    """Rows per grid step: aim for MXU M >= target_m, keep >= 2 grid steps
    (v7x: 2 TensorCores), and require the block count to divide N."""
    want = max(1, target_m // max(seq_len, 1))
    if n >= 2:
        want = min(want, n // 2)
    want = max(1, min(want, n))
    for b in range(want, 0, -1):
        if n % b == 0:
            return b
    return 1


def fused_conv_bn_relu(x_nlc, w2d, shift, *, pad, taps,
                       compute_dtype=jnp.float32):
    """x_nlc: (N, L, C_in) -> (N, L, C_out_pad), all branches fused."""
    N, L, C_in = x_nlc.shape
    K, c_out_pad = w2d.shape
    assert K == taps * C_in
    out_dtype = x_nlc.dtype
    b_blk = _pick_batch_block(N, L)

    kernel = functools.partial(_fused_conv_bn_relu_kernel, taps=taps, pad=pad,
                               seq_len=L, b_blk=b_blk, c_in=C_in)
    y2d = pl.pallas_call(
        kernel,
        out_shape=jax.ShapeDtypeStruct((N * L, c_out_pad), out_dtype),
        grid=(N // b_blk,),
        in_specs=[
            pl.BlockSpec((b_blk, L, C_in), lambda n: (n, 0, 0)),
            pl.BlockSpec((taps * C_in, c_out_pad), lambda n: (0, 0)),  # resident
            pl.BlockSpec((1, c_out_pad), lambda n: (0, 0)),            # resident
        ],
        out_specs=pl.BlockSpec((b_blk * L, c_out_pad), lambda n: (n, 0)),
        scratch_shapes=[pltpu.VMEM((b_blk, L, taps * C_in), jnp.float32)],
        compiler_params=pltpu.CompilerParams(
            dimension_semantics=("parallel",)),
    )(x_nlc.astype(compute_dtype), w2d, shift)
    return y2d.reshape(N, L, c_out_pad)


def init_textcnn_params(key, input_dim, output_dim, kernel_sizes):
    """Deterministic synthetic parameters (PyTorch Conv1d/BatchNorm1d shapes)."""
    params = {"convs": [], "bn": {}}
    keys = jax.random.split(key, 2 * len(kernel_sizes) + 4)
    for i, k in enumerate(kernel_sizes):
        # PyTorch Conv1d weight layout: (C_out, C_in, k).
        w = jax.random.normal(keys[2 * i], (output_dim, input_dim, k),
                              jnp.float32) * 0.1
        b = jax.random.normal(keys[2 * i + 1], (output_dim,), jnp.float32) * 0.1
        params["convs"].append({"w": w, "b": b})
    params["bn"] = {
        "gamma": 1.0 + 0.1 * jax.random.normal(keys[-4], (output_dim,), jnp.float32),
        "beta": 0.1 * jax.random.normal(keys[-3], (output_dim,), jnp.float32),
        "running_mean": 0.1 * jax.random.normal(keys[-2], (output_dim,), jnp.float32),
        "running_var": jnp.abs(jax.random.normal(keys[-1], (output_dim,),
                                                 jnp.float32)) + 1.0,
        "eps": 1e-5,
    }
    return params


def _fold_params(params, compute_dtype=jnp.float32):
    """Fold conv bias + eval-mode BN into one combined im2col weight / shift.

    Returns:
      w2d         : (taps*C_in, C_out_pad)  BN-scaled, tap-major folded weights,
                                            zero-padded to a 128-multiple of
                                            output channels, cast to compute_dtype
      shift       : (1, C_out_pad) f32      (b - mean)*scale + beta (0 in padding)
      pad, taps   : conv geometry (taps = 2*pad+1)
      c_out_total : number of real (unpadded) output channels
    """
    bn = params["bn"]
    scale = bn["gamma"] * jax.lax.rsqrt(bn["running_var"] + bn["eps"])
    c_out, c_in = params["convs"][0]["w"].shape[:2]
    ks = [c["w"].shape[-1] for c in params["convs"]]
    for k in ks:
        assert k % 2 == 1, "only odd kernel sizes preserve L with padding=k//2"
    pad = max(k // 2 for k in ks)
    taps = 2 * pad + 1
    n_br = len(params["convs"])
    c_out_total = n_br * c_out
    c_out_pad = ((c_out_total + 127) // 128) * 128   # lane-dense output width

    w_big = jnp.zeros((taps, c_in, c_out_pad), jnp.float32)
    shift = jnp.zeros((1, c_out_pad), jnp.float32)
    for i, c in enumerate(params["convs"]):
        k = c["w"].shape[-1]
        p = k // 2
        # (C_out, C_in, k) -> (k, C_in, C_out), BN scale folded per out-channel.
        w_kcd = jnp.transpose(c["w"], (2, 1, 0)) * scale[None, None, :]
        w_big = w_big.at[pad - p:pad - p + k, :,
                         i * c_out:(i + 1) * c_out].set(w_kcd)
        shift = shift.at[0, i * c_out:(i + 1) * c_out].set(
            (c["b"] - bn["running_mean"]) * scale + bn["beta"])
    # Tap-major, channel-minor K ordering matches the kernel's patch layout.
    w2d = w_big.reshape(taps * c_in, c_out_pad).astype(compute_dtype)
    return w2d, shift, pad, taps, c_out_total


def textcnn_forward_nlc(params, x_nlc, *, compute_dtype=jnp.float32):
    """NLC-in / NLC-out path (preferred: no HBM relayout transposes)."""
    w2d, shift, pad, taps, c_out_total = _fold_params(params, compute_dtype)
    y_pad = fused_conv_bn_relu(x_nlc, w2d, shift, pad=pad, taps=taps,
                               compute_dtype=compute_dtype)
    return y_pad[:, :, :c_out_total]   # drop the lane-padding channels


def textcnn_forward(params, x_ncl, *, compute_dtype=jnp.float32):
    """x_ncl: (N, C_in, L) like PyTorch. Returns (N, len(kernel_sizes)*C_out, L).

    NOTE: the two transposes are full HBM relayouts performed by XLA; in a real
    pipeline prefer textcnn_forward_nlc end-to-end and keep activations NLC.
    """
    x_nlc = jnp.transpose(x_ncl, (0, 2, 1))          # NCL -> NLC (lane = channels)
    y_nlc = textcnn_forward_nlc(params, x_nlc, compute_dtype=compute_dtype)
    return jnp.transpose(y_nlc, (0, 2, 1))           # NLC -> NCL (already concat'd)


def _reference_forward(params, x_ncl):
    """Pure-JAX reference (same eval-mode BN semantics), f32."""
    bn = params["bn"]
    scale = bn["gamma"] * jax.lax.rsqrt(bn["running_var"] + bn["eps"])
    shift = bn["beta"] - bn["running_mean"] * scale
    x_nlc = jnp.transpose(x_ncl, (0, 2, 1))
    N, L, _ = x_nlc.shape
    outs = []
    for c in params["convs"]:
        w = c["w"]                       # (C_out, C_in, k)
        k = w.shape[-1]
        p = k // 2
        xp = jnp.pad(x_nlc, ((0, 0), (p, p), (0, 0)))
        acc = jnp.zeros((N, L, w.shape[0]), jnp.float32)
        for t in range(k):
            acc = acc + jnp.einsum("nlc,cd->nld", xp[:, t:t + L, :],
                                   jnp.transpose(w[:, :, t]))
        y = (acc + c["b"]) * scale + shift
        outs.append(jnp.transpose(jnp.maximum(y, 0.0), (0, 2, 1)))
    return jnp.concatenate(outs, axis=1)


if __name__ == "__main__":
    # Small shapes consistent with the module: Conv1d(input_dim, output_dim, k).
    # N=8 so the batched grid has 2 steps of B_blk=4 rows each.
    N, INPUT_DIM, OUTPUT_DIM, L = 8, 32, 16, 16
    KERNEL_SIZES = [1, 3, 5]   # odd sizes -> padding=k//2 preserves length L

    key = jax.random.PRNGKey(0)
    kx, kp = jax.random.split(key)
    x = jax.random.normal(kx, (N, INPUT_DIM, L), jnp.float32)
    params = init_textcnn_params(kp, INPUT_DIM, OUTPUT_DIM, KERNEL_SIZES)

    ref = jax.block_until_ready(_reference_forward(params, x))
    expected_shape = (N, len(KERNEL_SIZES) * OUTPUT_DIM, L)

    # f32 compute path (v5e-friendly): tight tolerance.
    out_f32 = jax.block_until_ready(textcnn_forward(params, x))
    assert out_f32.shape == expected_shape, out_f32.shape
    assert jnp.allclose(out_f32, ref, atol=1e-4, rtol=1e-4), "f32 mismatch"

    # bf16 compute path (v6e/v7x MXU rate, halved DMA): looser tolerance vs f32 ref.
    out_bf16 = jax.block_until_ready(
        textcnn_forward(params, x, compute_dtype=jnp.bfloat16))
    assert out_bf16.shape == expected_shape, out_bf16.shape
    assert jnp.allclose(out_bf16, ref, atol=5e-2, rtol=5e-2), "bf16 mismatch"

    print("KERNEL_OK")
</pallas_src>

<mosaic_0001>
module attributes {stable_mosaic.version = 11 : i64} {
  func.func @_fused_conv_bn_relu_kernel(%arg0: i32, %arg1: memref<4x16x32xf32, #tpu.memory_space<vmem>>, %arg2: memref<160x128xf32, #tpu.memory_space<vmem>>, %arg3: memref<1x128xf32, #tpu.memory_space<vmem>>, %arg4: memref<64x128xf32, #tpu.memory_space<vmem>>, %arg5: memref<4x16x160xf32, #tpu.memory_space<vmem>>) attributes {dimension_semantics = [#tpu.dimension_semantics<parallel>], iteration_bounds = array<i64: 2>, scalar_prefetch = 0 : i64, scratch_operands = 1 : i64, tpu.core_type = #tpu.core_type<tc>, window_params = [{transform_indices = @transform_0, window_bounds = array<i64: 4, 16, 32>}, {pipeline_mode = #tpu.pipeline_mode<synchronous>, transform_indices = @transform_1, window_bounds = array<i64: 160, 128>}, {pipeline_mode = #tpu.pipeline_mode<synchronous>, transform_indices = @transform_2, window_bounds = array<i64: 1, 128>}, {transform_indices = @transform_3, window_bounds = array<i64: 64, 128>}]} {
    %c0 = arith.constant 0 : index
    %c0_0 = arith.constant 0 : index
    %c0_1 = arith.constant 0 : index
    %0 = vector.load %arg1[%c0, %c0_0, %c0_1] : memref<4x16x32xf32, #tpu.memory_space<vmem>>, vector<4x16x32xf32>
    %cst = arith.constant 0.000000e+00 : f32
    %1 = vector.broadcast %cst : f32 to vector<4x2x32xf32>
    %c0_2 = arith.constant 0 : index
    %c0_3 = arith.constant 0 : index
    %c0_4 = arith.constant 0 : index
    %2 = vector.load %arg5[%c0_2, %c0_3, %c0_4] : memref<4x16x160xf32, #tpu.memory_space<vmem>>, vector<4x2x32xf32>
    tpu.vector_store %arg5[%c0_2, %c0_3, %c0_4], %1 {strides = array<i32>} : memref<4x16x160xf32, #tpu.memory_space<vmem>>, vector<4x2x32xf32>,
    %3 = vector.extract_strided_slice %0 {offsets = [0, 0, 0], sizes = [4, 14, 32], strides = [1, 1, 1]} : vector<4x16x32xf32> to vector<4x14x32xf32>
    %c0_5 = arith.constant 0 : index
    %c2 = arith.constant 2 : index
    %c0_6 = arith.constant 0 : index
    %4 = vector.load %arg5[%c0_5, %c2, %c0_6] : memref<4x16x160xf32, #tpu.memory_space<vmem>>, vector<4x14x32xf32>
    tpu.vector_store %arg5[%c0_5, %c2, %c0_6], %3 {strides = array<i32>} : memref<4x16x160xf32, #tpu.memory_space<vmem>>, vector<4x14x32xf32>,
    %cst_7 = arith.constant 0.000000e+00 : f32
    %5 = vector.broadcast %cst_7 : f32 to vector<4x1x32xf32>
    %c0_8 = arith.constant 0 : index
    %c0_9 = arith.constant 0 : index
    %c32 = arith.constant 32 : index
    %6 = vector.load %arg5[%c0_8, %c0_9, %c32] : memref<4x16x160xf32, #tpu.memory_space<vmem>>, vector<4x1x32xf32>
    tpu.vector_store %arg5[%c0_8, %c0_9, %c32], %5 {strides = array<i32>} : memref<4x16x160xf32, #tpu.memory_space<vmem>>, vector<4x1x32xf32>,
    %7 = vector.extract_strided_slice %0 {offsets = [0, 0, 0], sizes = [4, 15, 32], strides = [1, 1, 1]} : vector<4x16x32xf32> to vector<4x15x32xf32>
    %c0_10 = arith.constant 0 : index
    %c1 = arith.constant 1 : index
    %c32_11 = arith.constant 32 : index
    %8 = vector.load %arg5[%c0_10, %c1, %c32_11] : memref<4x16x160xf32, #tpu.memory_space<vmem>>, vector<4x15x32xf32>
    tpu.vector_store %arg5[%c0_10, %c1, %c32_11], %7 {strides = array<i32>} : memref<4x16x160xf32, #tpu.memory_space<vmem>>, vector<4x15x32xf32>,
    %c0_12 = arith.constant 0 : index
    %c0_13 = arith.constant 0 : index
    %c64 = arith.constant 64 : index
    %9 = vector.load %arg5[%c0_12, %c0_13, %c64] : memref<4x16x160xf32, #tpu.memory_space<vmem>>, vector<4x16x32xf32>
    tpu.vector_store %arg5[%c0_12, %c0_13, %c64], %0 {strides = array<i32>} : memref<4x16x160xf32, #tpu.memory_space<vmem>>, vector<4x16x32xf32>,
    %cst_14 = arith.constant 0.000000e+00 : f32
    %10 = vector.broadcast %cst_14 : f32 to vector<4x1x32xf32>
    %c0_15 = arith.constant 0 : index
    %c15 = arith.constant 15 : index
    %c96 = arith.constant 96 : index
    %11 = vector.load %arg5[%c0_15, %c15, %c96] : memref<4x16x160xf32, #tpu.memory_space<vmem>>, vector<4x1x32xf32>
    tpu.vector_store %arg5[%c0_15, %c15, %c96], %10 {strides = array<i32>} : memref<4x16x160xf32, #tpu.memory_space<vmem>>, vector<4x1x32xf32>,
    %12 = vector.extract_strided_slice %0 {offsets = [0, 1, 0], sizes = [4, 15, 32], strides = [1, 1, 1]} : vector<4x16x32xf32> to vector<4x15x32xf32>
    %c0_16 = arith.constant 0 : index
    %c0_17 = arith.constant 0 : index
    %c96_18 = arith.constant 96 : index
    %13 = vector.load %arg5[%c0_16, %c0_17, %c96_18] : memref<4x16x160xf32, #tpu.memory_space<vmem>>, vector<4x15x32xf32>
    tpu.vector_store %arg5[%c0_16, %c0_17, %c96_18], %12 {strides = array<i32>} : memref<4x16x160xf32, #tpu.memory_space<vmem>>, vector<4x15x32xf32>,
    %cst_19 = arith.constant 0.000000e+00 : f32
    %14 = vector.broadcast %cst_19 : f32 to vector<4x2x32xf32>
    %c0_20 = arith.constant 0 : index
    %c14 = arith.constant 14 : index
    %c128 = arith.constant 128 : index
    %15 = vector.load %arg5[%c0_20, %c14, %c128] : memref<4x16x160xf32, #tpu.memory_space<vmem>>, vector<4x2x32xf32>
    tpu.vector_store %arg5[%c0_20, %c14, %c128], %14 {strides = array<i32>} : memref<4x16x160xf32, #tpu.memory_space<vmem>>, vector<4x2x32xf32>,
    %16 = vector.extract_strided_slice %0 {offsets = [0, 2, 0], sizes = [4, 14, 32], strides = [1, 1, 1]} : vector<4x16x32xf32> to vector<4x14x32xf32>
    %c0_21 = arith.constant 0 : index
    %c0_22 = arith.constant 0 : index
    %c128_23 = arith.constant 128 : index
    %17 = vector.load %arg5[%c0_21, %c0_22, %c128_23] : memref<4x16x160xf32, #tpu.memory_space<vmem>>, vector<4x14x32xf32>
    tpu.vector_store %arg5[%c0_21, %c0_22, %c128_23], %16 {strides = array<i32>} : memref<4x16x160xf32, #tpu.memory_space<vmem>>, vector<4x14x32xf32>,
    %c0_24 = arith.constant 0 : index
    %c0_25 = arith.constant 0 : index
    %c0_26 = arith.constant 0 : index
    %18 = vector.load %arg5[%c0_24, %c0_25, %c0_26] : memref<4x16x160xf32, #tpu.memory_space<vmem>>, vector<4x16x160xf32>
    %19 = vector.shape_cast %18 : vector<4x16x160xf32> to vector<64x160xf32>
    %c0_27 = arith.constant 0 : index
    %c0_28 = arith.constant 0 : index
    %20 = vector.load %arg2[%c0_27, %c0_28] : memref<160x128xf32, #tpu.memory_space<vmem>>, vector<160x128xf32>
    %cst_29 = arith.constant dense<0.000000e+00> : vector<64x128xf32>
    %21 = tpu.matmul %19, %20, %cst_29 {dimension_numbers = #tpu.dot_dimension_numbers<[1], [0], [0], [1], [0, 0, 1, 1], [], []>} : vector<64x160xf32>, vector<160x128xf32>, vector<64x128xf32> -> vector<64x128xf32>
    %c0_30 = arith.constant 0 : index
    %c0_31 = arith.constant 0 : index
    %22 = vector.load %arg3[%c0_30, %c0_31] : memref<1x128xf32, #tpu.memory_space<vmem>>, vector<1x128xf32>
    %23 = vector.broadcast %22 : vector<1x128xf32> to vector<64x128xf32>
    %24 = arith.addf %21, %23 : vector<64x128xf32>
    %cst_32 = arith.constant 0.000000e+00 : f32
    %25 = vector.broadcast %cst_32 : f32 to vector<64x128xf32>
    %26 = arith.maximumf %24, %25 : vector<64x128xf32>
    %c0_33 = arith.constant 0 : index
    %c0_34 = arith.constant 0 : index
    %27 = vector.load %arg4[%c0_33, %c0_34] : memref<64x128xf32, #tpu.memory_space<vmem>>, vector<64x128xf32>
    tpu.vector_store %arg4[%c0_33, %c0_34], %26 {strides = array<i32>} : memref<64x128xf32, #tpu.memory_space<vmem>>, vector<64x128xf32>,
    return
  }
  func.func @transform_0(%arg0: i32) -> (i32, i32, i32) {
    %c0_i32 = arith.constant 0 : i32
    %c0_i32_0 = arith.constant 0 : i32
    %c0_i32_1 = arith.constant 0 : i32
    return %arg0, %c0_i32, %c0_i32_0 : i32, i32, i32
  }
  func.func @transform_1(%arg0: i32) -> (i32, i32) {
    %c0_i32 = arith.constant 0 : i32
    %c0_i32_0 = arith.constant 0 : i32
    %c0_i32_1 = arith.constant 0 : i32
    return %c0_i32, %c0_i32_0 : i32, i32
  }
  func.func @transform_2(%arg0: i32) -> (i32, i32) {
    %c0_i32 = arith.constant 0 : i32
    %c0_i32_0 = arith.constant 0 : i32
    %c0_i32_1 = arith.constant 0 : i32
    return %c0_i32, %c0_i32_0 : i32, i32
  }
  func.func @transform_3(%arg0: i32) -> (i32, i32) {
    %c0_i32 = arith.constant 0 : i32
    %c0_i32_0 = arith.constant 0 : i32
    return %arg0, %c0_i32 : i32, i32
  }
}

</mosaic_0001>

<bundles_post_ra>
// kernel: tpu_custom_call.1
= control target key start
LH: loop header
LB: loop body
LE: loop exit
PB: predicated region body
PF: predicated region fallthrough
CT: control target
= control target key end

     0   :  { %8 = vsyncpa [#allocation4], 0  ;;  %s1362_s0 = inlined_call_operand.hbm [shape: f32[8,16,32], index: 0, kind: input, shape index: {}]   ;;  %s1363_s1 = inlined_call_operand.hbm [shape: f32[160,128], index: 1, kind: input, shape index: {}]   ;;  %s1364_s2 = inlined_call_operand.vmem [shape: f32[1,128], index: 2, kind: input, shape index: {}]   ;;  %s1365_s3 = inlined_call_operand.hbm [shape: f32[128,128], index: 3, kind: output, shape index: {}]  }
   0x1   :  { %10 = vsyncpa [#allocation4 + $0x1], 0 }
   0x2   :  { %11 = vsyncpa [#allocation7], 0 }
   0x3   :  { %12 = vsyncpa [#allocation5], 0 }
   0x4   :  { %14 = vsyncpa [#allocation5 + $0x1], 0  ;;  %s987_s12 = smov 0   ;;  %s989_s13 = smov 0  }
   0x5   :  { %s991_s14 = smov 0   ;;  %s993_s15 = smov 0  }
   0x6 LB: > { %s1008_s16 = sadd.s32 4294967295, %s956_s15   ;;  %s696_s17 = sadd.s32 4294967294, %s956_s15   ;;  %s956_s15 = sphi %s993_s15, %s1375_s15   ;;  %s952_s14 = sphi %s991_s14, %s1374_s14   ;;  %s948_s13 = sphi %s989_s13, %s1373_s13   ;;  %s944_s12 = sphi %s987_s12, %s1372_s12  }
   0x7   : > { %p40_p0 = scmp.ne.s32.totalorder %s948_s13, %s944_s12  ;;  %p41_p1 = scmp.eq.s32.totalorder %s1008_s16, 0 }
   0x8   : > { %p106_p2 = scmp.eq.s32.totalorder %s1008_s16, 1  ;;  %p112_p3 = scmp.eq.s32.totalorder %s696_s17, 1 }
   0x9   : > { %p1017_p4 = por %p41_p1, %p40_p0  ;;  %p697_p5 = scmp.ge.s32.totalorder %s956_s15, 1 }
   0xa   : > { %p1022_p6 = por %p112_p3, %p40_p0  ;;  %p119_p7 = scmp.lt.s32.totalorder %s956_s15, 3 }
   0xb   : > { %s130_s22 = sshll.u32 %s1363_s1, 4  ;;  %s958_s24 = smov [#allocation6]   ;;  %s131_s22 = int_to_ptr.hbm [resolvable:$true] %s130_s22 }
   0xc   : > { %p1030_p8 = pnand %p697_p5, %p119_p7  ;;  %s132_s25 = sshll.u32 %s958_s24, 4  ;;  %s133_s25 = int_to_ptr.vmem [resolvable:$true] %s132_s25 }
   0xd   : > { %s1040_s26 = sadd.s32 1, %s956_s15   ;;  %s959_s27 = smov 128  }
   0xe   : > { %p768_p9 = pneg %p1030_p8  ;;  %s960_s28 = smov 8  }
   0xf   : > { %s24_s29 = ssub.s32 %s956_s15, %s1040_s26  ;;  %s27_s30 = sadd.s32 1, %s952_s14 }
  0x10   : > { %p769_p10 = pnand %p768_p9, %p41_p1  ;;  %p25_p12 = scmp.eq.s32.totalorder %s24_s29, 0 }
  0x11   : > { %p34_p13 = scmp.ne.s32.totalorder %s952_s14, %s948_s13  ;;  %p35_p0 = scmp.eq.s32.totalorder %s956_s15, 0 }
  0x12   : > { %771 = dma.hbm_to_vmem [thread:$0]  (!%p769_p10), %s131_s22, 2560, %s133_s25, [#allocation7], %s959_s27, %s959_s27, %s960_s28  }
  0x13   : > { %s1052_s4 = scalar_select %p25_p12, %s952_s14, %s27_s30  }
  0x14   : > { %p1056_p3 = por %p106_p2, %p34_p13  ;;  %p781_p5 = scmp.lt.s32.totalorder %s956_s15, 2 }
  0x15   : > { %s149_s6 = sand.u32 1, %s952_s14   ;;  %s722_s7 = sshll.u32 %s956_s15, 6 }
  0x16   : > { %p36_p7 = por %p35_p0, %p34_p13  ;;  %s700_s8 = sshll.u32 %s149_s6, 6 }
  0x17   : > { %s159_s11 = scalar_lea.hbm %s1362_s0, %s722_s7  ;;  %s153_s20 = scalar_lea.vmem [#allocation3], %s700_s8 }
  0x18   : > { %s160_s17 = sshll.u32 %s159_s11, 4  ;;  %s162_s21 = sshll.u32 %s153_s20, 4  ;;  %s161_s17 = int_to_ptr.hbm [resolvable:$true] %s160_s17  ;;  %s163_s21 = int_to_ptr.vmem [resolvable:$true] %s162_s21 }
  0x19   : > { %p1066_p9 = pnand %p781_p5, %p36_p7  ;;  %s150_s24 = scalar_lea.sflag [#allocation4], %s149_s6 }
  0x1a   : > { %s856_s25 = sshra.s32 %s161_s17, 4  ;;  %s863_s8 = scalar_lea.hbm %s1362_s0, 128  ;;  %s857_s25 = int_to_ptr.hbm [resolvable:$true] %s856_s25 }
  0x1b   : > { %s858_s29 = scalar_lea.hbm %s857_s25, 64  ;;  %p860_p10 = pneg %p1066_p9 }
  0x1c   : > { %p859_p2 = scmp.ne.s32.totalorder %s857_s25, %s858_s29  ;;  %p864_p0 = scmp.lt.s32.totalorder %s857_s25, %s1362_s0 }
  0x1d   : > { %p865_p5 = scmp.lt.s32.totalorder %s863_s8, %s858_s29 }
  0x1e   : > { %p861_p12 = pnand %p860_p10, %p859_p2 }
  0x1f   : > { %p866_p7 = por %p865_p5, %p864_p0 }
  0x20   : > { %p862_p13 = pneg %p861_p12 }
  0x22   : > { %p867_p11 = pnand %p866_p7, %p862_p13 }
  0x24   : > { %870 = shalt.err (!%p867_p11)
}
  0x25   : > { %775 = dma.hbm_to_vmem [thread:$0]  (!%p1066_p9), %s161_s17, 1024, %s163_s21, %s150_s24, %s959_s27, %s959_s27, %s960_s28  }
  0x26   : > { %174 = sbr.rel (%p1030_p8) target bundleno = 365 (0x16d), region = 32  ;;  %s1086_s6 = sand.u32 (!%p1030_p8), 1, %s948_s13  }
  0x27   : > { %s705_s11 = sshll.u32 (!%p1030_p8), %s1086_s6, 6  ;;  %s177_s20 = scalar_lea.sflag (!%p1030_p8), [#allocation4], %s1086_s6 }
  0x28   : > { %s1092_s25 = scalar_lea.vmem (!%p1030_p8), [#allocation3], %s705_s11 }
  0x2b   : > { %931 = dma.done.wait (%p1017_p4), %s177_s20, 1024  }
  0x2c   : > { %933 = vsyncadd (%p1017_p4), %s177_s20, 4294966272 }
  0x2d   : > { %935 = dma.done.wait (%p41_p1), [#allocation7], 2560  }
  0x2e   : > { %937 = vsyncadd (%p41_p1), [#allocation7], 4294964736  ;;  %v1103_v0 = vld [vmem:[%s1092_s25 + $0x18] sm:$0xff]  ;;  %v1106_v1 = vld [vmem:[%s1092_s25 + $0x10] sm:$0xff]  ;;  %vm427_vm0 = vcmask 259072   ;;  %s961_s23 = smov 64  }
  0x2f   : > { %v1109_v2 = vld [vmem:[%s1092_s25 + $0x20] sm:$0xff]  ;;  %321 = vrot.lane.b32.xlu0 %v1103_v0, %s961_s23  ;;  %v410_v3 = vrot.slane %v1103_v0, 2  ;;  %v358_v4 = vrot.slane %v1103_v0, 1  ;;  %v272_v5 = vrot.slane %v1106_v1, 7  ;;  %v273_v6 = vrot.slane %v1103_v0, 7  ;;  %v1122_v9 = vld [vmem:[%s1092_s25 + $0x28] sm:$0xff] }
  0x30   : > { %323 = vrot.lane.b32.xlu2 %v1109_v2, %s961_s23  ;;  %v409_v7 = vrot.slane %v1106_v1, 2  ;;  %v412_v8 = vrot.slane %v1109_v2, 2  ;;  %s962_s18 = smov 96   ;;  %vm268_vm1 = vcmask 1040384   ;;  %vm405_vm2 = vcmask 1045504   ;;  %v1130_v11 = vld [vmem:[%s1092_s25 + $0x38] sm:$0xff] }
  0x31   : > { %430 = vst.msk [vmem:[#allocation2 + $0x38] sm:$0x3f] %vm427_vm0, %v410_v3  ;;  %372 = vrot.lane.b32.xlu1 %v358_v4, %s962_s18  ;;  %v413_v10 = vrot.slane %v1122_v9, 2  ;;  %vm255_vm3 = vcmask 261120   ;;  %v1134_v13 = vld [vmem:[%s1092_s25] sm:$0xff]  ;;  %v1137_v14 = vld [vmem:[%s1092_s25 + $0x30] sm:$0xff]  ;;  %v274_v19 = vsel %vm268_vm1, %v272_v5, %v273_v6 }
  0x32   : > { %v411_v12 = vsel %vm405_vm2, %v409_v7, %v410_v3  ;;  %v416_v16 = vrot.slane %v1130_v11, 2  ;;  %v406_v17 = vrot.slane %v1134_v13, 2  ;;  %v1144_v18 = vld [vmem:[%s1092_s25 + $0x8] sm:$0xff]  ;;  %v278_v21 = vrot.slane %v1137_v14, 7  ;;  %s963_s27 = smov 32   ;;  %v466_v37 = vld [vmem:[#allocation6 + $0x78] sm:$0xff] }
  0x33   : > { %429 = vst.msk [vmem:[#allocation2 + $0x28] sm:$0xff] %vm255_vm3, %v411_v12  ;;  %v414_v15 = vsel %vm405_vm2, %v412_v8, %v413_v10  ;;  %v407_v20 = vrot.slane %v1144_v18, 2  ;;  %v279_v22 = vrot.slane %v1130_v11, 7  ;;  %v275_v23 = vrot.slane %v1109_v2, 7  ;;  %v465_v38 = vld [vmem:[#allocation6 + $0x70] sm:$0xff]  ;;  %724 = vmatpush.msra.mxu2 %v466_v37  ;;  %v1185_v39 = vld [vmem:[#allocation6 + $0x98] sm:$0xff]  ;;  %725 = vmatpush.msra.mxu3 %v466_v37 }
  0x34   : > { %431 = vst.msk [vmem:[#allocation2 + $0x48] sm:$0xff] %vm255_vm3, %v414_v15  ;;  %v415_v24 = vrot.slane %v1137_v14, 2  ;;  %v360_v28 = vrot.slane %v1109_v2, 1  ;;  %v361_v29 = vrot.slane %v1122_v9, 1  ;;  %vm353_vm4 = vcmask 1046528   ;;  %v464_v40 = vld [vmem:[#allocation6 + $0x68] sm:$0xff]  ;;  %552 = vmatpush.msra.mxu1 %v1185_v39  ;;  %499 = vmatpush.msra.mxu0 %v466_v37 }
  0x35   : > { %432 = vst.msk [vmem:[#allocation2 + $0x58] sm:$0x3f] %vm427_vm0, %v413_v10  ;;  %v408_v25 = vsel %vm405_vm2, %v406_v17, %v407_v20  ;;  %v280_v26 = vsel %vm268_vm1, %v278_v21, %v279_v22  ;;  %v364_v30 = vrot.slane %v1130_v11, 1  ;;  %v276_v32 = vrot.slane %v1122_v9, 7  ;;  %v1188_v41 = vld [vmem:[#allocation6 + $0x90] sm:$0xff]  ;;  %726 = vmatpush.msra.mxu2 %v465_v38  ;;  %727 = vmatpush.msra.mxu3 %v465_v38  ;;  %v463_v43 = vld [vmem:[#allocation6 + $0x60] sm:$0xff] }
  0x36   : > { %434 = vst.msk [vmem:[#allocation2 + $0x78] sm:$0x3f] %vm427_vm0, %v416_v16  ;;  %v417_v27 = vsel %vm405_vm2, %v415_v24, %v416_v16  ;;  %v362_v31 = vsel %vm353_vm4, %v360_v28, %v361_v29  ;;  %v269_v33 = vrot.slane %v1134_v13, 7  ;;  %v354_v35 = vrot.slane %v1134_v13, 1  ;;  %553 = vmatpush.msra.mxu1 %v1188_v41  ;;  %v1192_v44 = vld [vmem:[#allocation6 + $0x88] sm:$0xff]  ;;  %500 = vmatpush.msra.mxu0 %v465_v38  ;;  %v462_v45 = vld [vmem:[#allocation6 + $0x58] sm:$0xff] }
  0x37   : > { %287 = vrot.lane.b32.xlu0 %v274_v19, %s963_s27  ;;  %426 = vst.msk [vmem:[#allocation2 + $0x8] sm:$0xff] %vm255_vm3, %v408_v25  ;;  %v277_v34 = vsel %vm268_vm1, %v275_v23, %v276_v32  ;;  %v355_v36 = vrot.slane %v1144_v18, 1  ;;  %728 = vmatpush.msra.mxu2 %v464_v40  ;;  %v270_v46 = vrot.slane %v1144_v18, 7  ;;  %v461_v47 = vld [vmem:[#allocation6 + $0x50] sm:$0xff]  ;;  %v460_v48 = vld [vmem:[#allocation6 + $0x48] sm:$0xff]  ;;  %v363_v50 = vrot.slane %v1137_v14, 1 }
  0x38   : > { %295 = vrot.lane.b32.xlu2 %v280_v26, %s963_s27  ;;  %428 = vst.msk [vmem:[#allocation2 + $0x18] sm:$0x3f] %vm427_vm0, %v407_v20  ;;  %729 = vmatpush.msra.mxu3 %v464_v40  ;;  %v357_v52 = vrot.slane %v1106_v1, 1  ;;  %v459_v54 = vld [vmem:[#allocation6 + $0x40] sm:$0xff]  ;;  %v458_v57 = vld [vmem:[#allocation6 + $0x38] sm:$0xff]  ;;  %v457_v58 = vld [vmem:[#allocation6 + $0x30] sm:$0xff] }
  0x39   : > { %289 = vrot.lane.b32.xlu1 %v275_v23, %s963_s27  ;;  %433 = vst.msk [vmem:[#allocation2 + $0x68] sm:$0xff] %vm255_vm3, %v417_v27  ;;  %v356_v42 = vsel %vm353_vm4, %v354_v35, %v355_v36  ;;  %730 = vmatpush.msra.mxu2 %v463_v43  ;;  %v271_v49 = vsel %vm268_vm1, %v269_v33, %v270_v46  ;;  %v1223_v55 = vld [vmem:[#allocation6 + $0x80] sm:$0xff]  ;;  %v237_v59 = vrot.slane %v1103_v0, 6  ;;  %vm400_vm5 = vcmask 261126   ;;  %v456_v60 = vld [vmem:[#allocation6 + $0x28] sm:$0xff]  ;;  %v453_v7 = vld [vmem:[#allocation6 + $0x10] sm:$0xff] }
  0x3a   : > { %554 = vmatpush.msra.mxu1 %v1192_v44  ;;  %731 = vmatpush.msra.mxu3 %v463_v43  ;;  %v365_v51 = vsel %vm353_vm4, %v363_v50, %v364_v30  ;;  %v359_v53 = vsel %vm353_vm4, %v357_v52, %v358_v4  ;;  %vm232_vm6 = vcmask 1041408   ;;  %v964_v61 = vmov 0.0   ;;  %v455_v4 = vld [vmem:[#allocation6 + $0x20] sm:$0xff]  ;;  %v452_v10 = vld [vmem:[#allocation6 + $0x8] sm:$0xff]  ;;  %s1318_s21 = scalar_lea.vmem [#allocation8], %s705_s11  ;;  %s723_s22 = sshll.u32 %s1008_s16, 6 }
  0x3b   : > { %732 = vmatpush.msra.mxu2 %v462_v45  ;;  %501 = vmatpush.msra.mxu0 %v464_v40  ;;  %401 = vst.msk [vmem:[#allocation2 + $0x18] sm:$0xc0] %vm400_vm5, %v964_v61  ;;  %v236_v62 = vrot.slane %v1106_v1, 6  ;;  %v239_v3 = vrot.slane %v1109_v2, 6  ;;  %vm219_vm7 = vcmask 254976   ;;  %vm253_vm8 = vcmask 261122   ;;  %s609_s30 = scalar_lea.hbm %s1365_s3, %s723_s22 }
  0x3c   : > { %733 = vmatpush.msra.mxu3 %v462_v45  ;;  %555 = vmatpush.msra.mxu1 %v1223_v55  ;;  %402 = vst.msk [vmem:[#allocation2 + $0x38] sm:$0xc0] %vm400_vm5, %v964_v61  ;;  %v454_v2 = vld [vmem:[#allocation6 + $0x18] sm:$0xff]  ;;  %vm307_vm9 = vcmask 523520   ;;  %vm263_vm10 = vcmask 516352   ;;  %v451_v12 = vld [vmem:[#allocation6] sm:$0xff] }
  0x3d   : > { %734 = vmatpush.msra.mxu2 %v461_v47  ;;  %502 = vmatpush.msra.mxu0 %v463_v43  ;;  %403 = vst.msk [vmem:[#allocation2 + $0x58] sm:$0xc0] %vm400_vm5, %v964_v61  ;;  %v238_v63 = vsel %vm232_vm6, %v236_v62, %v237_v59  ;;  %v233_v16 = vrot.slane %v1134_v13, 6  ;;  %v240_v17 = vrot.slane %v1122_v9, 6  ;;  %v444_v23 = vld [vmem:[#allocation2 + $0x48] sm:$0xff]  ;;  %vm339_vm11 = vcmask 785920  }
  0x3e   : > { %735 = vmatpush.msra.mxu3 %v461_v47  ;;  %v436_v56 = vld [vmem:[#allocation2 + $0x8] sm:$0xff]  ;;  %404 = vst.msk [vmem:[#allocation2 + $0x78] sm:$0xc0] %vm400_vm5, %v964_v61  ;;  %vm348_vm12 = vcmask 1041152   ;;  %vm305_vm13 = vcmask 523521   ;;  %vm392_vm14 = vcmask 1047296  }
  0x3f   : > { %374 = vrot.lane.b32.xlu0 %v362_v31, %s962_s18  ;;  %736 = vmatpush.msra.mxu2 %v460_v48  ;;  %258 = vst.msk [vmem:[#allocation2 + $0x30] sm:$0xff] %vm255_vm3, %v238_v63  ;;  %v241_v19 = vsel %vm232_vm6, %v239_v3, %v240_v17  ;;  %vm390_vm15 = vcmask 1048320   ;;  %s610_s7 = sshll.u32 %s1318_s21, 4  ;;  %s612_s8 = sshll.u32 %s609_s30, 4  ;;  %s611_s7 = int_to_ptr.vmem [resolvable:$true] %s610_s7  ;;  %s613_s8 = int_to_ptr.hbm [resolvable:$true] %s612_s8 }
  0x40   : > { %380 = vrot.lane.b32.xlu2 %v364_v30, %s962_s18  ;;  %503 = vmatpush.msra.mxu0 %v462_v45  ;;  %222 = vst.msk [vmem:[#allocation2 + $0x40] sm:$0x3] %vm219_vm7, %v964_v61  ;;  %v448_v38 = vld [vmem:[#allocation2 + $0x68] sm:$0xff]  ;;  %s598_s16 = scalar_lea.sflag [#allocation5], %s1086_s6  ;;  %s900_s9 = sshra.s32 %s613_s8, 4  ;;  %s901_s9 = int_to_ptr.hbm [resolvable:$true] %s900_s9 }
  0x41   : > { %329 = vrot.lane.b32.xlu1 %v1130_v11, %s961_s23  ;;  %737 = vmatpush.msra.mxu3 %v460_v48  ;;  %259 = vst.msk [vmem:[#allocation2 + $0x40] sm:$0xfc] %vm253_vm8, %v239_v3  ;;  %s902_s10 = scalar_lea.hbm %s901_s9, 64  ;;  %s906_s25 = scalar_lea.hbm %s1365_s3, 128 }
  0x42   : > { %504 = vmatpush.msra.mxu0 %v461_v47  ;;  %738 = vmatpush.msra.mxu2 %v459_v54  ;;  %v438_v6 = vld [vmem:[#allocation2 + $0x18] sm:$0xff]  ;;  %220 = vst.msk [vmem:[#allocation2] sm:$0x3] %vm219_vm7, %v964_v61  ;;  %p903_p1 = scmp.ne.s32.totalorder %s901_s9, %s902_s10  ;;  %p907_p11 = scmp.lt.s32.totalorder %s901_s9, %s1365_s3 }
  0x43   : > { %739 = vmatpush.msra.mxu3 %v459_v54  ;;  %708 = vmatmul.msk.f32.vlgmr.msra.gmra.mxu1 %vm255_vm3, %v436_v56  ;;  %221 = vst.msk [vmem:[#allocation2 + $0x20] sm:$0x3] %vm219_vm7, %v964_v61  ;;  %v442_v20 = vld [vmem:[#allocation2 + $0x38] sm:$0xff]  ;;  %v825_v56 = vld [vmem:[%s1364_s2] ss:$0 sm:$0xff]  ;;  %p908_p9 = scmp.lt.s32.totalorder %s906_s25, %s902_s10 }
  0x44   : > { %505 = vmatpush.msra.mxu0 %v460_v48  ;;  %740 = vmatpush.msra.mxu2 %v458_v57  ;;  %223 = vst.msk [vmem:[#allocation2 + $0x60] sm:$0x3] %vm219_vm7, %v964_v61  ;;  %v446_v30 = vld [vmem:[#allocation2 + $0x58] sm:$0xff]  ;;  %p904_p4 = pnand %p903_p1, %p1056_p3 }
  0x45   : > { %741 = vmatpush.msra.mxu3 %v458_v57  ;;  %257 = vst.msk [vmem:[#allocation2 + $0x20] sm:$0xfc] %vm253_vm8, %v236_v62  ;;  %p909_p2 = por %p908_p9, %p907_p11 }
  0x46   : > { %506 = vmatpush.msra.mxu0 %v459_v54  ;;  %742 = vmatpush.msra.mxu2 %v457_v58  ;;  %266 = vst.msk [vmem:[#allocation2 + $0x40] sm:$0x1] %vm263_vm10, %v964_v61  ;;  %p905_p8 = pneg %p904_p4 }
  0x47   : > { %281 = vrot.lane.b32.xlu0 %v269_v33, %s963_s27  ;;  %743 = vmatpush.msra.mxu3 %v457_v58  ;;  %264 = vst.msk [vmem:[#allocation2] sm:$0x1] %vm263_vm10, %v964_v61 }
  0x48   : > { %291 = vrot.lane.b32.xlu2 %v277_v34, %s963_s27  ;;  %507 = vmatpush.msra.mxu0 %v458_v57  ;;  %265 = vst.msk [vmem:[#allocation2 + $0x20] sm:$0x1] %vm263_vm10, %v964_v61  ;;  %p910_p10 = pnand %p909_p2, %p905_p8 }
  0x49   : > { %315 = vrot.lane.b32.xlu1 %v1134_v13, %s961_s23  ;;  %744 = vmatpush.msra.mxu2 %v456_v60  ;;  %267 = vst.msk [vmem:[#allocation2 + $0x60] sm:$0x1] %vm263_vm10, %v964_v61 }
  0x4a   : > { %508 = vmatpush.msra.mxu0 %v457_v58  ;;  %745 = vmatpush.msra.mxu3 %v456_v60  ;;  %254 = vst.msk [vmem:[#allocation2] sm:$0xfc] %vm253_vm8, %v233_v16 }
  0x4b   : > { %746 = vmatpush.msra.mxu2 %v455_v4  ;;  %709 = vmatmul.msk.f32.gmra.mxu1 %vm255_vm3, %v438_v6  ;;  %260 = vst.msk [vmem:[#allocation2 + $0x50] sm:$0xff] %vm255_vm3, %v241_v19 }
  0x4c   : > { %509 = vmatpush.msra.mxu0 %v456_v60  ;;  %747 = vmatpush.msra.mxu3 %v455_v4 }
  0x4d   : > { %748 = vmatpush.msra.mxu2 %v454_v2 }
  0x4e   : > { %510 = vmatpush.msra.mxu0 %v455_v4  ;;  %749 = vmatpush.msra.mxu3 %v454_v2 }
  0x4f   : > { %366 = vrot.lane.b32.xlu0 %v356_v42, %s962_s18  ;;  %750 = vmatpush.msra.mxu2 %v453_v7  ;;  %v450_v42 = vld [vmem:[#allocation2 + $0x78] sm:$0xff] }
  0x50   : > { %376 = vrot.lane.b32.xlu2 %v361_v29, %s962_s18  ;;  %511 = vmatpush.msra.mxu0 %v454_v2 }
  0x51   : > { %325 = vrot.lane.b32.xlu1 %v1122_v9, %s961_s23  ;;  %751 = vmatpush.msra.mxu3 %v453_v7  ;;  %v234_v9 = vrot.slane %v1144_v18, 6 }
  0x52   : > { %512 = vmatpush.msra.mxu0 %v453_v7  ;;  %752 = vmatpush.msra.mxu2 %v452_v10 }
  0x53   : > { %753 = vmatpush.msra.mxu3 %v452_v10  ;;  %v235_v27 = vsel %vm232_vm6, %v233_v16, %v234_v9 }
  0x54   : > { %513 = vmatpush.msra.mxu0 %v452_v10  ;;  %754 = vmatpush.msra.mxu2 %v451_v12  ;;  %256 = vst.msk [vmem:[#allocation2 + $0x10] sm:$0xff] %vm255_vm3, %v235_v27 }
  0x55   : > { %755 = vmatpush.msra.mxu3 %v451_v12 }
  0x56   : > { %514 = vmatpush.msra.mxu0 %v451_v12 }
  0x57   : > { %283 = vrot.lane.b32.xlu0 %v271_v49, %s963_s27  ;;  %756 = vmatpush.msrb.mxu3 %v1185_v39 }
  0x58   : > { %293 = vrot.lane.b32.xlu2 %v278_v21, %s963_s27 }
  0x59   : > { %317 = vrot.lane.b32.xlu1 %v1144_v18, %s961_s23  ;;  %757 = vmatpush.msrb.mxu3 %v1188_v41 }
  0x5b   : > { %758 = vmatpush.msrb.mxu3 %v1192_v44 }
  0x5d   : > { %759 = vmatpush.msrb.mxu3 %v1223_v55 }
  0x5f   : > { %368 = vrot.lane.b32.xlu0 %v355_v36, %s962_s18 }
  0x60   : > { %378 = vrot.lane.b32.xlu2 %v365_v51, %s962_s18 }
  0x61   : > { %327 = vrot.lane.b32.xlu1 %v1137_v14, %s961_s23 }
  0x67   : > { %285 = vrot.lane.b32.xlu0 %v272_v5, %s963_s27  ;;  %v242_v5 = vrot.slane %v1137_v14, 6  ;;  %v440_v14 = vld [vmem:[#allocation2 + $0x28] sm:$0xff] }
  0x68   : > { %370 = vrot.lane.b32.xlu2 %v359_v53, %s962_s18  ;;  %710 = vmatmul.msk.f32.gmra.mxu1 %vm255_vm3, %v440_v14 }
  0x69   : > { %319 = vrot.lane.b32.xlu1 %v1106_v1, %s961_s23  ;;  %v243_v1 = vrot.slane %v1130_v11, 6  ;;  %261 = vst.msk [vmem:[#allocation2 + $0x60] sm:$0xfc] %vm253_vm8, %v242_v5 }
  0x6b   : > { %v244_v8 = vsel %vm232_vm6, %v242_v5, %v243_v1 }
  0x6c   : > { %262 = vst.msk [vmem:[#allocation2 + $0x70] sm:$0xff] %vm255_vm3, %v244_v8 }
  0x70   : > { %711 = vmatmul.msk.f32.gmra.mxu1 %vm255_vm3, %v442_v20 }
  0x78   : > { %712 = vmatmul.msk.f32.gmra.mxu1 %vm255_vm3, %v444_v23 }
  0x80   : > { %713 = vmatmul.msk.f32.gmra.mxu1 %vm255_vm3, %v446_v30 }
  0x8a   : > { %v1234_v0 = vpop.permute.xlu2 %323 }
  0x92   : > { %v296_v11 = vpop.permute.xlu2 %295 }
  0x93   : > { %314 = vst.msk [vmem:[#allocation2 + $0x70] sm:$0xff] %vm307_vm9, %v296_v11 }
  0x9a   : > { %v381_v15 = vpop.permute.xlu2 %380 }
  0xa1   : > { %v322_v21 = vpop.permute.xlu0 %321 }
  0xa2   : > { %v292_v22 = vpop.permute.xlu2 %291 }
  0xa3   : > { %312 = vst.msk [vmem:[#allocation2 + $0x50] sm:$0xff] %vm307_vm9, %v292_v22  ;;  %v373_v13 = vpop.permute.xlu1 %372 }
  0xa9   : > { %v288_v24 = vpop.permute.xlu0 %287 }
  0xaa   : > { %v377_v25 = vpop.permute.xlu2 %376  ;;  %310 = vst.msk [vmem:[#allocation2 + $0x30] sm:$0xff] %vm307_vm9, %v288_v24 }
  0xab   : > { %343 = vst.msk [vmem:[#allocation2 + $0x30] sm:$0xff] %vm339_vm11, %v322_v21  ;;  %v290_v26 = vpop.permute.xlu1 %289 }
  0xac   : > { %350 = vst.msk [vmem:[#allocation2 + $0x37] sm:$0x1] %vm348_vm12, %v964_v61 }
  0xad   : > { %311 = vst.msk [vmem:[#allocation2 + $0x40] sm:$0xfe] %vm305_vm13, %v290_v26 }
  0xae   : > { %344 = vst.msk [vmem:[#allocation2 + $0x40] sm:$0xff] %vm339_vm11, %v1234_v0 }
  0xaf   : > { %395 = vst.msk [vmem:[#allocation2 + $0x30] sm:$0x7f] %vm392_vm14, %v373_v13 }
  0xb1   : > { %v375_v18 = vpop.permute.xlu0 %374 }
  0xb2   : > { %v294_v28 = vpop.permute.xlu2 %293  ;;  %396 = vst.msk [vmem:[#allocation2 + $0x40] sm:$0xff] %vm390_vm15, %v375_v18 }
  0xb3   : > { %v330_v29 = vpop.permute.xlu1 %329  ;;  %313 = vst.msk [vmem:[#allocation2 + $0x60] sm:$0xfe] %vm305_vm13, %v294_v28 }
  0xb4   : > { %347 = vst.msk [vmem:[#allocation2 + $0x70] sm:$0xff] %vm339_vm11, %v330_v29 }
  0xb5   : > { %352 = vst.msk [vmem:[#allocation2 + $0x77] sm:$0x1] %vm348_vm12, %v964_v61 }
  0xb6   : > { %399 = vst.msk [vmem:[#allocation2 + $0x70] sm:$0x7f] %vm392_vm14, %v381_v15  ;;  %v441_v31 = vld [vmem:[#allocation2 + $0x30] sm:$0xff] }
  0xb7   : > { %524 = vmatmul.f32.vlgmr.msra.gmra.mxu2 %v441_v31 }
  0xb9   : > { %v282_v32 = vpop.permute.xlu0 %281  ;;  %v443_v34 = vld [vmem:[#allocation2 + $0x40] sm:$0xff] }
  0xba   : > { %306 = vst.msk [vmem:[#allocation2] sm:$0xfe] %vm305_vm13, %v282_v32  ;;  %v379_v44 = vpop.permute.xlu2 %378 }
  0xbb   : > { %v316_v33 = vpop.permute.xlu1 %315 }
  0xbc   : > { %340 = vst.msk [vmem:[#allocation2] sm:$0xff] %vm339_vm11, %v316_v33 }
  0xbd   : > { %v449_v35 = vld [vmem:[#allocation2 + $0x70] sm:$0xff] }
  0xbe   : > { %536 = vmatmul.f32.vlgmr.msra.gmra.mxu3 %v449_v35 }
  0xbf   : > { %527 = vmatmul.f32.gmra.mxu2 %v443_v34 }
  0xc0   : > { %v557_v53 = vpop.f32.mrf.mxu1 }
  0xc1   : > { %v367_v36 = vpop.permute.xlu0 %366 }
  0xc2   : > { %391 = vst.msk [vmem:[#allocation2] sm:$0xff] %vm390_vm15, %v367_v36  ;;  %v371_v49 = vpop.permute.xlu2 %370 }
  0xc3   : > { %v326_v37 = vpop.permute.xlu1 %325 }
  0xc4   : > { %345 = vst.msk [vmem:[#allocation2 + $0x50] sm:$0xff] %vm339_vm11, %v326_v37 }
  0xc5   : > { %351 = vst.msk [vmem:[#allocation2 + $0x57] sm:$0x1] %vm348_vm12, %v964_v61 }
  0xc6   : > { %397 = vst.msk [vmem:[#allocation2 + $0x50] sm:$0x7f] %vm392_vm14, %v377_v25  ;;  %714 = vmatmul.msk.f32.vlgmr.msrb.gmra.mxu3 %vm255_vm3, %v448_v38 }
  0xc8   : > { %v560_v54 = vpop.f32.mrf.mxu1 }
  0xc9   : > { %v284_v39 = vpop.permute.xlu0 %283  ;;  %v435_v40 = vld [vmem:[#allocation2] sm:$0xff] }
  0xca   : > { %308 = vst.msk [vmem:[#allocation2 + $0x10] sm:$0xff] %vm307_vm9, %v284_v39  ;;  %515 = vmatmul.f32.vlgmr.msra.gmra.mxu0 %v435_v40 }
  0xcb   : > { %v318_v41 = vpop.permute.xlu1 %317 }
  0xcc   : > { %341 = vst.msk [vmem:[#allocation2 + $0x10] sm:$0xff] %vm339_vm11, %v318_v41 }
  0xcd   : > { %349 = vst.msk [vmem:[#allocation2 + $0x17] sm:$0x1] %vm348_vm12, %v964_v61  ;;  %v445_v43 = vld [vmem:[#allocation2 + $0x50] sm:$0xff] }
  0xce   : > { %530 = vmatmul.f32.gmra.mxu2 %v445_v43  ;;  %715 = vmatmul.msk.f32.gmra.mxu3 %vm255_vm3, %v450_v42 }
  0xd1   : > { %v369_v45 = vpop.permute.xlu0 %368 }
  0xd2   : > { %393 = vst.msk [vmem:[#allocation2 + $0x10] sm:$0x7f] %vm392_vm14, %v369_v45 }
  0xd3   : > { %v328_v46 = vpop.permute.xlu1 %327 }
  0xd4   : > { %346 = vst.msk [vmem:[#allocation2 + $0x60] sm:$0xff] %vm339_vm11, %v328_v46 }
  0xd5   : > { %398 = vst.msk [vmem:[#allocation2 + $0x60] sm:$0xff] %vm390_vm15, %v379_v44 }
  0xd9   : > { %v286_v47 = vpop.permute.xlu0 %285  ;;  %v437_v48 = vld [vmem:[#allocation2 + $0x10] sm:$0xff] }
  0xda   : > { %309 = vst.msk [vmem:[#allocation2 + $0x20] sm:$0xfe] %vm305_vm13, %v286_v47  ;;  %518 = vmatmul.f32.gmra.mxu0 %v437_v48 }
  0xdb   : > { %v320_v50 = vpop.permute.xlu1 %319 }
  0xdc   : > { %342 = vst.msk [vmem:[#allocation2 + $0x20] sm:$0xff] %vm339_vm11, %v320_v50  ;;  %v447_v51 = vld [vmem:[#allocation2 + $0x60] sm:$0xff] }
  0xdd   : > { %394 = vst.msk [vmem:[#allocation2 + $0x20] sm:$0xff] %vm390_vm15, %v371_v49  ;;  %533 = vmatmul.f32.gmra.mxu2 %v447_v51 }
  0xe4   : > { %v439_v52 = vld [vmem:[#allocation2 + $0x20] sm:$0xff] }
  0xe5   : > { %521 = vmatmul.f32.gmra.mxu0 %v439_v52  ;;  %v563_v55 = vpop.f32.mrf.mxu1 }
  0xed   : > { %v566_v57 = vpop.f32.mrf.mxu1 }
  0xf5   : > { %v569_v0 = vpop.f32.mrf.mxu1 }
  0xfd   : > { %v572_v11 = vpop.f32.mrf.mxu1 }
 0x13a   : > { %v525_v58 = vpop.f32.mrf.mxu2 }
 0x13b   : > { %v526_v59 = vadd.f32 %v825_v56, %v525_v58 }
 0x13d   : > { %v567_v60 = vadd.f32 %v566_v57, %v526_v59 }
 0x13f   : > { %v584_v61 = vmax.f32 %v567_v60, 0.0 }
 0x141   : > { %592 = vst [vmem:[%s1318_s21 + $0x18] sm:$0xff] %v584_v61  ;;  %v537_v62 = vpop.f32.mrf.mxu3 }
 0x142   : > { %v528_v63 = vpop.f32.mrf.mxu2  ;;  %v538_v10 = vadd.f32 %v825_v56, %v537_v62 }
 0x143   : > { %v529_v3 = vadd.f32 %v825_v56, %v528_v63 }
 0x145   : > { %v570_v1 = vadd.f32 %v569_v0, %v529_v3 }
 0x147   : > { %v585_v4 = vmax.f32 %v570_v1, 0.0  ;;  %v516_v5 = vpop.f32.mrf.mxu0 }
 0x148   : > { %v517_v6 = vadd.f32 %v825_v56, %v516_v5 }
 0x149   : > { %593 = vst [vmem:[%s1318_s21 + $0x20] sm:$0xff] %v585_v4  ;;  %v575_v2 = vpop.f32.mrf.mxu3 }
 0x14a   : > { %v558_v7 = vadd.f32 %v557_v53, %v517_v6 }
 0x14c   : > { %v581_v8 = vmax.f32 %v558_v7, 0.0 }
 0x14e   : > { %589 = vst [vmem:[%s1318_s21] sm:$0xff] %v581_v8 }
 0x151   : > { %v531_v12 = vpop.f32.mrf.mxu2  ;;  %v578_v14 = vpop.f32.mrf.mxu3 }
 0x152   : > { %v532_v15 = vadd.f32 %v825_v56, %v531_v12  ;;  %v579_v16 = vadd.f32 %v578_v14, %v538_v10 }
 0x154   : > { %v588_v17 = vmax.f32 %v579_v16, 0.0  ;;  %v573_v19 = vadd.f32 %v572_v11, %v532_v15 }
 0x156   : > { %596 = vst [vmem:[%s1318_s21 + $0x38] sm:$0xff] %v588_v17  ;;  %v586_v20 = vmax.f32 %v573_v19, 0.0 }
 0x157   : > { %v519_v21 = vpop.f32.mrf.mxu0 }
 0x158   : > { %594 = vst [vmem:[%s1318_s21 + $0x28] sm:$0xff] %v586_v20  ;;  %v520_v22 = vadd.f32 %v825_v56, %v519_v21 }
 0x15a   : > { %v561_v13 = vadd.f32 %v560_v54, %v520_v22 }
 0x15c   : > { %v582_v23 = vmax.f32 %v561_v13, 0.0 }
 0x15e   : > { %590 = vst [vmem:[%s1318_s21 + $0x8] sm:$0xff] %v582_v23 }
 0x160   : > { %v534_v24 = vpop.f32.mrf.mxu2 }
 0x161   : > { %v535_v25 = vadd.f32 %v825_v56, %v534_v24 }
 0x162   : > { %v522_v9 = vpop.f32.mrf.mxu0 }
 0x163   : > { %v576_v26 = vadd.f32 %v575_v2, %v535_v25  ;;  %v523_v27 = vadd.f32 %v825_v56, %v522_v9 }
 0x165   : > { %v587_v18 = vmax.f32 %v576_v26, 0.0  ;;  %v564_v28 = vadd.f32 %v563_v55, %v523_v27 }
 0x167   : > { %595 = vst [vmem:[%s1318_s21 + $0x30] sm:$0xff] %v587_v18  ;;  %v583_v29 = vmax.f32 %v564_v28, 0.0 }
 0x169   : > { %591 = vst [vmem:[%s1318_s21 + $0x10] sm:$0xff] %v583_v29 }
 0x16a   : > { %913 = shalt.err (!%p910_p10)
}
 0x16b   : > { %s965_s6 = smov 128   ;;  %s966_s27 = smov 8  }
 0x16c   : > { %766 = dma.vmem_to_hbm [thread:$0]  (%p1056_p3), %s611_s7, 1024, %s613_s8, %s598_s16, %s965_s6, %s965_s6, %s966_s27  }
 0x16d PF: > { %s627_s28 = sand.u32 1, %s944_s12   ;;  %p1371_p12 = scmp.ge.s32.totalorder %s956_s15, 2 }
 0x16e   : > { %s628_s17 = scalar_lea.sflag [#allocation5], %s627_s28 }
 0x16f   : > { %p777_p13 = pnand %p1371_p12, %p1022_p6 }
 0x171   : > { %p778_p0 = pneg %p777_p13 }
 0x173   : > { %939 = dma.done.wait (%p778_p0), %s628_s17, 1024  }
 0x174   : > { %941 = vsyncadd (%p778_p0), %s628_s17, 4294966272  ;;  %p17_p5 = scmp.ge.s32.totalorder %s1040_s26, 4   ;;  %s1372_s12 = smov %s948_s13 }
 0x175   : > { %s1373_s13 = smov %s952_s14  ;;  %s1374_s14 = smov %s1052_s4 }
 0x176   : > { %s1375_s15 = smov %s1040_s26  ;;  %19 = sbr.rel (!%p17_p5) target bundleno = 6 (0x6), region = 81 }
 0x17b   :  { %634 = vsyncpa [#allocation4], 1 }
 0x17c   :  { %636 = vsyncpa [#allocation4 + $0x1], 1 }
 0x17d   :  { %637 = vsyncpa [#allocation7], 1 }
 0x17e   :  { %638 = vsyncpa [#allocation5], 1 }
 0x17f   :  { %640 = vsyncpa [#allocation5 + $0x1], 1 }

</bundles_post_ra>
